<compile_context>
chip_gen: v6e
topology: v6e:2x2x1
jax: 0.10.0
libtpu: 0.0.40
codegen_flags: <defaults>
</compile_context>

<pallas_src>
import jax
import jax.numpy as jnp
from jax.experimental import pallas as pl
from jax.experimental.pallas import tpu as pltpu


# ----------------------------------------------------------------------------
# Kernel
# ----------------------------------------------------------------------------
def critic_kernel(x_ref, w1_ref, b1_ref, w2_ref, b2_ref, w3_ref, b3_ref, o_ref):
    # x arrives in its original (fp32) dtype; cast to bf16 in-register (VPU work
    # that hides completely under the x HBM->VMEM DMA).
    x = x_ref[...].astype(jnp.bfloat16)

    # Layer 1: (tile_b, d_in) @ (d_in, 64) -> fp32 acc, bias + ReLU in fp32.
    h1 = jnp.dot(x, w1_ref[...], preferred_element_type=jnp.float32)
    h1 = jnp.maximum(h1 + b1_ref[...], 0.0)

    # Layer 2: (tile_b, 64) @ (64, 32) -> fp32 acc, bias + ReLU in fp32.
    h2 = jnp.dot(h1.astype(jnp.bfloat16), w2_ref[...],
                 preferred_element_type=jnp.float32)
    h2 = jnp.maximum(h2 + b2_ref[...], 0.0)

    # Value head (out_features = 1), computed LANE-DENSE: contract the
    # 32-feature axis of h2 against the (1, 32) w3 row so the result is a
    # (1, tile_b) row (batch along lanes) -> unmasked full-lane stores.
    v = jax.lax.dot_general(
        w3_ref[...], h2,
        dimension_numbers=(((1,), (1,)), ((), ())),
        preferred_element_type=jnp.float32,
    )                                                       # (1, tile_b)
    o_ref[...] = jnp.reshape(v + b3_ref[...], o_ref.shape)  # (1, 1, tile_b)


# ----------------------------------------------------------------------------
# Tiling / VMEM budgeting
# ----------------------------------------------------------------------------
def _round_up(x, m):
    return ((x + m - 1) // m) * m


def _vmem_budget_and_limit():
    """(tile-sizing budget, Mosaic vmem_limit_bytes), per TPU generation."""
    cap = None
    try:
        cap = int(getattr(pltpu.get_tpu_info(), "vmem_capacity_bytes", 0)) or None
    except Exception:
        cap = None
    if cap is None:
        # Conservative fallback: v7x has 64 MiB VMEM per TensorCore
        # (v5e / v6e have 128 MiB), so this stays safe on every generation.
        cap = 64 * 1024 * 1024
    return int(cap * 0.60), int(cap * 0.75)


def _choose_tile_b(batch, d_in, vmem_budget_bytes):
    """Pick the batch-tile size from the batch size, d_in and the VMEM budget."""
    d_lanes = _round_up(max(d_in, 1), 128)        # x block is lane-padded to 128
    # VMEM-resident weights (bf16 w1/w2 + small fp32 biases/head), upper bound.
    weight_bytes = (_round_up(max(d_in, 1), 16) * 128 * 2   # w1 (bf16, lane-padded)
                    + 64 * 128 * 2                          # w2
                    + 16 * 1024)                            # biases / w3 / b3
    # Per-row VMEM: double-buffered fp32 x block + in-kernel bf16 copy of x +
    # fp32/bf16 intermediates (lane-padded) + double-buffered fp32 output row.
    bytes_per_row = 2 * 4 * d_lanes + 2 * d_lanes + 6 * 128 * 4 + 2 * 4
    avail = max(vmem_budget_bytes - weight_bytes, 8 * bytes_per_row)
    vmem_rows = max((avail // bytes_per_row) // 8 * 8, 8)

    b_ceil = _round_up(max(batch, 1), 8)
    # 16K rows amortizes the ~0.35us per-grid-step overhead even for tiny d_in.
    tile = min(b_ceil, 16384, vmem_rows)
    # v7x megacore: keep >= 2 grid steps once there is enough work so
    # dimension_semantics=("parallel",) can feed both TensorCores.
    if b_ceil >= 256:
        tile = min(tile, _round_up(pl.cdiv(b_ceil, 2), 128))
    # Multiples of 128 keep the lane-dense output unmasked and sublanes packed.
    if tile >= 128:
        tile = (tile // 128) * 128
    return max((tile // 8) * 8, 8)


# ----------------------------------------------------------------------------
# Parameters
# ----------------------------------------------------------------------------
def init_params(key, input_dim):
    """Deterministic fp32 parameters matching the PyTorch module's shapes.

    PyTorch nn.Linear(in, out) has weight (out, in), bias (out,); here weights
    are stored already transposed to (in, out).
    """
    ks = jax.random.split(key, 6)
    scale = lambda fan_in: 1.0 / jnp.sqrt(jnp.float32(fan_in))
    w1 = jax.random.uniform(ks[0], (input_dim, 64), jnp.float32, -1, 1) * scale(input_dim)
    b1 = jax.random.uniform(ks[1], (1, 64), jnp.float32, -1, 1) * scale(input_dim)
    w2 = jax.random.uniform(ks[2], (64, 32), jnp.float32, -1, 1) * scale(64)
    b2 = jax.random.uniform(ks[3], (1, 32), jnp.float32, -1, 1) * scale(64)
    w3 = jax.random.uniform(ks[4], (32, 1), jnp.float32, -1, 1) * scale(32)
    b3 = jax.random.uniform(ks[5], (1, 1), jnp.float32, -1, 1) * scale(32)
    return (w1, b1, w2, b2, w3, b3)


def prepare_params(params):
    """Cast / reshape the fp32 parameters ONCE into the kernel's layout."""
    w1, b1, w2, b2, w3, b3 = params
    return (
        w1.astype(jnp.bfloat16),
        jnp.reshape(b1, (1, 64)).astype(jnp.float32),
        w2.astype(jnp.bfloat16),
        jnp.reshape(b2, (1, 32)).astype(jnp.float32),
        jnp.reshape(w3, (1, 32)).astype(jnp.float32),   # value head as a row
        jnp.reshape(b3, (1, 1)).astype(jnp.float32),
    )


# ----------------------------------------------------------------------------
# Wrapper
# ----------------------------------------------------------------------------
def critic_forward(x, prepared_params, *, tile_b=None):
    """Fused forward pass of the Critic MLP as one batch-tiled Pallas kernel."""
    w1c, b1c, w2c, b2c, w3row, b3c = prepared_params
    B, d_in = x.shape
    assert w1c.shape[0] == d_in, "input feature dim does not match w1"

    vmem_budget, vmem_limit = _vmem_budget_and_limit()
    if tile_b is None:
        tile_b = _choose_tile_b(B, d_in, vmem_budget)
    if tile_b <= 0 or tile_b % 8 != 0:
        raise ValueError(f"tile_b must be a positive multiple of 8, got {tile_b}")

    num_tiles = pl.cdiv(B, tile_b)

    # Weights/biases: constant index_map -> loaded once, VMEM-resident for the grid.
    def const_spec(a):
        return pl.BlockSpec(a.shape, lambda i, _nd=a.ndim: (0,) * _nd)

    out = pl.pallas_call(
        critic_kernel,
        # Lane-dense output: one (1, tile_b) fp32 row per grid step.
        out_shape=jax.ShapeDtypeStruct((num_tiles, 1, tile_b), jnp.float32),
        grid=(num_tiles,),
        in_specs=[
            # x streamed per batch tile in its ORIGINAL dtype (no wrapper copy);
            # the tail block past B is implicitly padded by Pallas and its
            # outputs are sliced off below.
            pl.BlockSpec((tile_b, d_in), lambda i: (i, 0)),
            const_spec(w1c),
            const_spec(b1c),
            const_spec(w2c),
            const_spec(b2c),
            const_spec(w3row),
            const_spec(b3c),
        ],
        out_specs=pl.BlockSpec((1, 1, tile_b), lambda i: (i, 0, 0)),
        compiler_params=pltpu.CompilerParams(
            dimension_semantics=("parallel",),   # megacore sharding on v7x
            vmem_limit_bytes=vmem_limit,
        ),
    )(x, w1c, b1c, w2c, b2c, w3row, b3c)

    # (num_tiles, 1, tile_b) -> (B, 1); padded tail rows are dropped.
    return out.reshape(num_tiles * tile_b)[:B].reshape(B, 1).astype(x.dtype)


# ----------------------------------------------------------------------------
# References
# ----------------------------------------------------------------------------
def critic_ref_fp32(x, params):
    """Plain-JAX fp32 reference (PyTorch forward semantics)."""
    w1, b1, w2, b2, w3, b3 = params
    h1 = jnp.maximum(x @ w1 + jnp.reshape(b1, (1, -1)), 0.0)
    h2 = jnp.maximum(h1 @ w2 + jnp.reshape(b2, (1, -1)), 0.0)
    return h2 @ w3 + jnp.reshape(b3, (1, 1))


def critic_ref_bf16(x, params):
    """Reference with the same bf16 operand quantization / fp32 accumulation."""
    w1, b1, w2, b2, w3, b3 = params
    h1 = jnp.dot(x.astype(jnp.bfloat16), w1.astype(jnp.bfloat16),
                 preferred_element_type=jnp.float32)
    h1 = jnp.maximum(h1 + jnp.reshape(b1, (1, -1)), 0.0)
    h2 = jnp.dot(h1.astype(jnp.bfloat16), w2.astype(jnp.bfloat16),
                 preferred_element_type=jnp.float32)
    h2 = jnp.maximum(h2 + jnp.reshape(b2, (1, -1)), 0.0)
    return (jnp.sum(h2 * jnp.reshape(w3, (1, -1)), axis=-1, keepdims=True)
            + jnp.reshape(b3, (1, 1)))


if __name__ == "__main__":
    key = jax.random.PRNGKey(0)
    k_x, k_x2, k_x3, k_p = jax.random.split(key, 4)

    B, D_IN = 8, 16  # small batch of observations, small observation dim
    x = jax.random.normal(k_x, (B, D_IN), dtype=jnp.float32)
    raw_params = init_params(k_p, D_IN)
    params = prepare_params(raw_params)   # cast / reshape once, reused per call

    # 1) Small batch, single exact tile.
    out = jax.block_until_ready(critic_forward(x, params))
    assert out.shape == (B, 1)
    assert jnp.allclose(out, critic_ref_bf16(x, raw_params), atol=1e-4, rtol=1e-4), \
        "mismatch vs bf16 reference"
    assert jnp.allclose(out, critic_ref_fp32(x, raw_params), atol=5e-2, rtol=5e-2), \
        "mismatch vs fp32 reference"

    # 2) Multi-tile grid with a non-divisible batch (exercises implicit tail padding).
    B2 = 300
    x2 = jax.random.normal(k_x2, (B2, D_IN), dtype=jnp.float32)
    out2 = jax.block_until_ready(critic_forward(x2, params, tile_b=128))
    assert out2.shape == (B2, 1)
    assert jnp.allclose(out2, critic_ref_bf16(x2, raw_params), atol=1e-4, rtol=1e-4), \
        "multi-tile mismatch vs bf16 reference"

    # 3) Larger batch with auto-chosen tile (exercises the >=2-tile megacore split).
    B3 = 1000
    x3 = jax.random.normal(k_x3, (B3, D_IN), dtype=jnp.float32)
    out3 = jax.block_until_ready(critic_forward(x3, params))
    assert out3.shape == (B3, 1)
    assert jnp.allclose(out3, critic_ref_bf16(x3, raw_params), atol=1e-4, rtol=1e-4), \
        "auto-tile mismatch vs bf16 reference"

    print("KERNEL_OK")
</pallas_src>

<mosaic_0001>
module attributes {stable_mosaic.version = 11 : i64} {
  func.func @critic_kernel(%arg0: i32, %arg1: memref<8x16xf32, #tpu.memory_space<vmem>>, %arg2: memref<16x64xbf16, #tpu.memory_space<vmem>>, %arg3: memref<1x64xf32, #tpu.memory_space<vmem>>, %arg4: memref<64x32xbf16, #tpu.memory_space<vmem>>, %arg5: memref<1x32xf32, #tpu.memory_space<vmem>>, %arg6: memref<1x32xf32, #tpu.memory_space<vmem>>, %arg7: memref<1x1xf32, #tpu.memory_space<vmem>>, %arg8: memref<1x1x8xf32, #tpu.memory_space<vmem>>) attributes {dimension_semantics = [#tpu.dimension_semantics<parallel>], iteration_bounds = array<i64: 1>, scalar_prefetch = 0 : i64, scratch_operands = 0 : i64, tpu.core_type = #tpu.core_type<tc>, window_params = [{transform_indices = @transform_0, window_bounds = array<i64: 8, 16>}, {pipeline_mode = #tpu.pipeline_mode<synchronous>, transform_indices = @transform_1, window_bounds = array<i64: 16, 64>}, {pipeline_mode = #tpu.pipeline_mode<synchronous>, transform_indices = @transform_2, window_bounds = array<i64: 1, 64>}, {pipeline_mode = #tpu.pipeline_mode<synchronous>, transform_indices = @transform_3, window_bounds = array<i64: 64, 32>}, {pipeline_mode = #tpu.pipeline_mode<synchronous>, transform_indices = @transform_4, window_bounds = array<i64: 1, 32>}, {pipeline_mode = #tpu.pipeline_mode<synchronous>, transform_indices = @transform_5, window_bounds = array<i64: 1, 32>}, {pipeline_mode = #tpu.pipeline_mode<synchronous>, transform_indices = @transform_6, window_bounds = array<i64: 1, 1>}, {transform_indices = @transform_7, window_bounds = array<i64: 1, 1, 8>}]} {
    %c0 = arith.constant 0 : index
    %c0_0 = arith.constant 0 : index
    %0 = vector.load %arg1[%c0, %c0_0] : memref<8x16xf32, #tpu.memory_space<vmem>>, vector<8x16xf32>
    %1 = arith.truncf %0 : vector<8x16xf32> to vector<8x16xbf16>
    %c0_1 = arith.constant 0 : index
    %c0_2 = arith.constant 0 : index
    %2 = vector.load %arg2[%c0_1, %c0_2] : memref<16x64xbf16, #tpu.memory_space<vmem>>, vector<16x64xbf16>
    %cst = arith.constant dense<0.000000e+00> : vector<8x64xf32>
    %3 = tpu.matmul %1, %2, %cst {dimension_numbers = #tpu.dot_dimension_numbers<[1], [0], [0], [1], [0, 0, 1, 1], [], []>} : vector<8x16xbf16>, vector<16x64xbf16>, vector<8x64xf32> -> vector<8x64xf32>
    %c0_3 = arith.constant 0 : index
    %c0_4 = arith.constant 0 : index
    %4 = vector.load %arg3[%c0_3, %c0_4] : memref<1x64xf32, #tpu.memory_space<vmem>>, vector<1x64xf32>
    %5 = vector.broadcast %4 : vector<1x64xf32> to vector<8x64xf32>
    %6 = arith.addf %3, %5 : vector<8x64xf32>
    %cst_5 = arith.constant 0.000000e+00 : f32
    %7 = vector.broadcast %cst_5 : f32 to vector<8x64xf32>
    %8 = arith.maximumf %6, %7 : vector<8x64xf32>
    %9 = arith.truncf %8 : vector<8x64xf32> to vector<8x64xbf16>
    %c0_6 = arith.constant 0 : index
    %c0_7 = arith.constant 0 : index
    %10 = vector.load %arg4[%c0_6, %c0_7] : memref<64x32xbf16, #tpu.memory_space<vmem>>, vector<64x32xbf16>
    %cst_8 = arith.constant dense<0.000000e+00> : vector<8x32xf32>
    %11 = tpu.matmul %9, %10, %cst_8 {dimension_numbers = #tpu.dot_dimension_numbers<[1], [0], [0], [1], [0, 0, 1, 1], [], []>} : vector<8x64xbf16>, vector<64x32xbf16>, vector<8x32xf32> -> vector<8x32xf32>
    %c0_9 = arith.constant 0 : index
    %c0_10 = arith.constant 0 : index
    %12 = vector.load %arg5[%c0_9, %c0_10] : memref<1x32xf32, #tpu.memory_space<vmem>>, vector<1x32xf32>
    %13 = vector.broadcast %12 : vector<1x32xf32> to vector<8x32xf32>
    %14 = arith.addf %11, %13 : vector<8x32xf32>
    %cst_11 = arith.constant 0.000000e+00 : f32
    %15 = vector.broadcast %cst_11 : f32 to vector<8x32xf32>
    %16 = arith.maximumf %14, %15 : vector<8x32xf32>
    %c0_12 = arith.constant 0 : index
    %c0_13 = arith.constant 0 : index
    %17 = vector.load %arg6[%c0_12, %c0_13] : memref<1x32xf32, #tpu.memory_space<vmem>>, vector<1x32xf32>
    %cst_14 = arith.constant dense<0.000000e+00> : vector<1x8xf32>
    %18 = tpu.matmul %17, %16, %cst_14 {dimension_numbers = #tpu.dot_dimension_numbers<[1], [1], [0], [0], [0, 0, 1, 0], [], []>} : vector<1x32xf32>, vector<8x32xf32>, vector<1x8xf32> -> vector<1x8xf32>
    %c0_15 = arith.constant 0 : index
    %c0_16 = arith.constant 0 : index
    %19 = vector.load %arg7[%c0_15, %c0_16] : memref<1x1xf32, #tpu.memory_space<vmem>>, vector<1x1xf32>
    %20 = vector.broadcast %19 : vector<1x1xf32> to vector<1x8xf32>
    %21 = arith.addf %18, %20 : vector<1x8xf32>
    %22 = vector.shape_cast %21 : vector<1x8xf32> to vector<1x1x8xf32>
    %c0_17 = arith.constant 0 : index
    %c0_18 = arith.constant 0 : index
    %c0_19 = arith.constant 0 : index
    %23 = vector.load %arg8[%c0_17, %c0_18, %c0_19] : memref<1x1x8xf32, #tpu.memory_space<vmem>>, vector<1x1x8xf32>
    tpu.vector_store %arg8[%c0_17, %c0_18, %c0_19], %22 {strides = array<i32>} : memref<1x1x8xf32, #tpu.memory_space<vmem>>, vector<1x1x8xf32>,
    return
  }
  func.func @transform_0(%arg0: i32) -> (i32, i32) {
    %c0_i32 = arith.constant 0 : i32
    %c0_i32_0 = arith.constant 0 : i32
    return %arg0, %c0_i32 : i32, i32
  }
  func.func @transform_1(%arg0: i32) -> (i32, i32) {
    %c0_i32 = arith.constant 0 : i32
    %c0_i32_0 = arith.constant 0 : i32
    %c0_i32_1 = arith.constant 0 : i32
    return %c0_i32, %c0_i32_0 : i32, i32
  }
  func.func @transform_2(%arg0: i32) -> (i32, i32) {
    %c0_i32 = arith.constant 0 : i32
    %c0_i32_0 = arith.constant 0 : i32
    %c0_i32_1 = arith.constant 0 : i32
    return %c0_i32, %c0_i32_0 : i32, i32
  }
  func.func @transform_3(%arg0: i32) -> (i32, i32) {
    %c0_i32 = arith.constant 0 : i32
    %c0_i32_0 = arith.constant 0 : i32
    %c0_i32_1 = arith.constant 0 : i32
    return %c0_i32, %c0_i32_0 : i32, i32
  }
  func.func @transform_4(%arg0: i32) -> (i32, i32) {
    %c0_i32 = arith.constant 0 : i32
    %c0_i32_0 = arith.constant 0 : i32
    %c0_i32_1 = arith.constant 0 : i32
    return %c0_i32, %c0_i32_0 : i32, i32
  }
  func.func @transform_5(%arg0: i32) -> (i32, i32) {
    %c0_i32 = arith.constant 0 : i32
    %c0_i32_0 = arith.constant 0 : i32
    %c0_i32_1 = arith.constant 0 : i32
    return %c0_i32, %c0_i32_0 : i32, i32
  }
  func.func @transform_6(%arg0: i32) -> (i32, i32) {
    %c0_i32 = arith.constant 0 : i32
    %c0_i32_0 = arith.constant 0 : i32
    %c0_i32_1 = arith.constant 0 : i32
    return %c0_i32, %c0_i32_0 : i32, i32
  }
  func.func @transform_7(%arg0: i32) -> (i32, i32, i32) {
    %c0_i32 = arith.constant 0 : i32
    %c0_i32_0 = arith.constant 0 : i32
    %c0_i32_1 = arith.constant 0 : i32
    return %arg0, %c0_i32, %c0_i32_0 : i32, i32, i32
  }
}

</mosaic_0001>

<bundles_post_ra>
// kernel: tpu_custom_call.1
= control target key start
LH: loop header
LB: loop body
LE: loop exit
PB: predicated region body
PF: predicated region fallthrough
CT: control target
= control target key end

     0   :  { %s433_s0 = inlined_call_operand.vmem [shape: f32[8,16], index: 0, kind: input, shape index: {}]   ;;  %s434_s1 = inlined_call_operand.vmem [shape: bf16[16,64], index: 1, kind: input, shape index: {}]   ;;  %s435_s2 = inlined_call_operand.vmem [shape: f32[1,64], index: 2, kind: input, shape index: {}]   ;;  %s436_s3 = inlined_call_operand.vmem [shape: bf16[64,32], index: 3, kind: input, shape index: {}]   ;;  %s437_s4 = inlined_call_operand.vmem [shape: f32[1,32], index: 4, kind: input, shape index: {}]   ;;  %s438_s5 = inlined_call_operand.vmem [shape: f32[1,32], index: 5, kind: input, shape index: {}]   ;;  %s439_s6 = inlined_call_operand.<no memory space> [shape: f32[1,1], index: 6, kind: input, shape index: {}]   ;;  %s440_s7 = inlined_call_operand.hbm [shape: f32[1,1,8], index: 7, kind: output, shape index: {}]  }
   0x1   :  { %v12_v0 = vstv %s439_s6 }
   0x2   :  { %13 = vst [vmem:[#allocation2] sm:$0x1] %v12_v0 }
   0x3   :  { %v329_v1 = vld [vmem:[%s434_s1] sm:$0xff]   ;;  %v356_v2 = vmov 0.0   ;;  %vm47_vm0 = vcmask 130048   ;;  %v330_v4 = vld [vmem:[%s436_s3 + $0x18] sm:$0xff]   ;;  %vm357_vm1 = vmmov 0   ;;  %v331_v6 = vld [vmem:[%s436_s3 + $0x10] sm:$0xff]  }
   0x4   :  { %301 = vmatprep.subr.bf16.mxu0 %v356_v2  ;;  %v30_v3 = vld [vmem:[%s433_s0] sm:$0xff]  ;;  %307 = vmatprep.subr.bf16.mxu1 %v356_v2 }
   0x5   :  { %302 = vmatpush3.bf16.msra.mxu0 %v329_v1  ;;  %303 = vmatprep.mubr.msk.bf16.mxu0 %vm357_vm1, %v356_v2  ;;  %v31_v5 = vpack.c.bf16 %v30_v3, %v30_v3 }
   0x6   :  { %308 = vmatpush3.bf16.msra.mxu1 %v330_v4  ;;  %315 = vmatprep.mubr.msk.bf16.mxu1 %vm357_vm1, %v356_v2 }
   0x7   :  { %309 = vmatprep.subr.bf16.mxu1 %v356_v2  ;;  %319 = vmatprep.subr.mxu0 %v356_v2 }
   0x8   :  { %304 = vmatmul.mubr.msk.bf16.vlgmr.msra.gmra.mxu0 %vm47_vm0, %v31_v5 }
   0x9   :  { %14 = vsyncpa [#allocation4], 0  ;;  %321 = vmatprep.mubr.msk.f32.mxu0 %vm357_vm1, %v356_v2  ;;  %v332_v7 = vld [vmem:[%s436_s3 + $0x8] sm:$0xff]   ;;  %v333_v8 = vld [vmem:[%s436_s3] sm:$0xff]   ;;  %vm132_vm2 = vcmask 523264   ;;  %v358_v18 = vmov 0   ;;  %v184_v27 = vlaneseq }
   0xa   :  { %310 = vmatpush3.bf16.msra.mxu1 %v331_v6  ;;  %v281_v9 = vld [vmem:[%s435_s2] ss:$0 sm:$0xff]  ;;  %328 = vset.pattern.permute.xlu0 %v358_v18  ;;  %vm188_vm3 = vcmask 261120   ;;  %s359_s16 = smov [#allocation3]   ;;  %vm265_vm4 = vcmask 57344  }
   0xb   :  { %311 = vmatprep.subr.bf16.mxu1 %v356_v2  ;;  %v178_v17 = vld [vmem:[#allocation2] sm:$0x1]  ;;  %v185_v28 = vshrl.u32 %v184_v27, 7 }
   0xc   :  { %181 = vperm.xlu0 %328, %v178_v17   ;;  %v284_v19 = vld [vmem:[%s437_s4] ss:$0 sm:$0xff]  ;;  %s273_s4 = sshll.u32 %s359_s16, 4  ;;  %s274_s4 = int_to_ptr.vmem [resolvable:$true] %s273_s4 }
   0xd   :  { %v177_v25 = vld [vmem:[%s438_s5] sm:$0x1]  ;;  %v186_v29 = vsub.s32 0, %v185_v28  ;;  %s334_s17 = scalar_lea.vmem %s274_s4, 16  ;;  %s338_s18 = scalar_lea.vmem %s274_s4, 32 }
   0xe   :  { %312 = vmatpush3.bf16.msra.mxu1 %v332_v7  ;;  %p335_p0 = scmp.ne.s32.totalorder %s274_s4, %s334_s17  ;;  %p339_p1 = scmp.lt.s32.totalorder %s274_s4, %s274_s4 }
   0xf   :  { %313 = vmatprep.subr.bf16.mxu1 %v356_v2  ;;  %p340_p2 = scmp.lt.s32.totalorder %s338_s18, %s334_s17 }
  0x11   :  { %p341_p3 = por %p340_p2, %p339_p1 }
  0x12   :  { %314 = vmatpush3.bf16.msra.mxu1 %v333_v8 }
  0x13   :  { %p342_p4 = pnand %p341_p3, %p335_p0 }
  0x87   :  { %v182_v30 = vpop.permute.xlu0 %181 }
  0x88   :  { %v187_v31 = vrot.slane %v182_v30, %v186_v29 }
  0xc8   :  { %v85_v10 = vpop.f32.mrf.mxu0 }
  0xc9   :  { %v86_v11 = vadd.f32 %v281_v9, %v85_v10 }
  0xca   :  { %v305_v12 = vpop.f32.mrf.mxu0 }
  0xcb   :  { %v91_v13 = vmax.f32 %v86_v11, 0.0 }
  0xcc   :  { %v88_v14 = vpop.f32.mrf.mxu0 }
  0xcd   :  { %v92_v15 = vpack.c.bf16 %v91_v13, %v91_v13 }
  0xce   :  { %v306_v16 = vpop.f32.mrf.mxu0 }
  0xcf   :  { %316 = vmatmul.mubr.msk.bf16.vlgmr.msra.gmra.mxu1 %vm132_vm2, %v92_v15 }
 0x18f   :  { %v170_v20 = vpop.f32.mrf.mxu1 }
 0x190   :  { %v171_v21 = vadd.f32 %v284_v19, %v170_v20 }
 0x191   :  { %v317_v22 = vpop.f32.mrf.mxu1 }
 0x192   :  { %v176_v23 = vmax.f32 %v171_v21, 0.0 }
 0x193   :  { %v173_v24 = vpop.f32.mrf.mxu1 }
 0x194   :  { %320 = vmatpush3.xpose.msk.msra.mxu0 %vm188_vm3, %v176_v23 }
 0x195   :  { %v318_v26 = vpop.f32.mrf.mxu1 }
 0x197   :  { %322 = vmatmul.mubr.msk.f32.vlgmr.msra.gmra.mxu0 %vm188_vm3, %v177_v25 }
 0x257   :  { %v261_v32 = vpop.f32.mrf.mxu0 }
 0x258   :  { %v262_v33 = vadd.f32 %v261_v32, %v187_v31 }
 0x259   :  { %v323_v34 = vpop.f32.mrf.mxu0 }
 0x25a   :  { %266 = vst.msk [vmem:[#allocation3] sm:$0x1] %vm265_vm4, %v262_v33 }
 0x25b   :  { %345 = shalt.err (!%p342_p4)
}
 0x25c   :  { %276 = dma.vmem_to_hbm [thread:$0]  %s274_s4, 16, %s440_s7, [#allocation4]  }
 0x25d   :  { %354 = dma.done.wait [#allocation4], 16  }
 0x25e   :  { %355 = vsyncadd [#allocation4], 4294967280 }
 0x25f   :  { %280 = vsyncpa [#allocation4], 1 }

</bundles_post_ra>
